<compile_context>
chip_gen: v6e
topology: v6e:2x2x1
jax: 0.10.0
libtpu: 0.0.40
codegen_flags: <defaults>
</compile_context>

<pallas_src>
import functools

import jax
import jax.numpy as jnp
from jax import lax
from jax.experimental import pallas as pl
from jax.experimental.pallas import tpu as pltpu


def _espionai_kernel(ids_ref, table_ref, o_ref, *, S):
    """One grid step == one batch row.

    ids_ref   : SMEM (B*S,) int32   -- scalar-prefetched token ids
    table_ref : VMEM (V, 1, H) f32  -- precomputed emb @ w1 + b1 (fc1 folded in)
    o_ref     : VMEM (1, 1, H) f32  -- mean over seq of ReLU(table[ids])
    """
    b = pl.program_id(0)
    H = o_ref.shape[-1]

    def body(s, acc):
        tok = ids_ref[b * S + s]              # SMEM scalar read
        row = table_ref[tok]                  # (1, H) dynamic row gather (leading dim)
        return acc + jnp.maximum(row, 0.0)    # fused ReLU + accumulate

    acc = lax.fori_loop(0, S, body, jnp.zeros((1, H), jnp.float32), unroll=True)
    o_ref[0] = acc * jnp.float32(1.0 / S)     # sequence mean


def espionai_forward(ids, emb, w1, b1, w2, b2):
    """ids: (B, S) int32; emb: (V, E); w1: (E, H); b1: (1, H); w2: (H, 1); b2: (1, 1)."""
    B, S = ids.shape
    V, E = emb.shape
    H = w1.shape[1]

    # Fold fc1 into the embedding table (affine o affine, ReLU comes after).
    # Static across calls in a real deployment; cheap XLA work here.
    table = (jnp.dot(emb, w1) + b1).astype(jnp.float32).reshape(V, 1, H)
    ids_flat = ids.reshape(B * S).astype(jnp.int32)

    kernel = functools.partial(_espionai_kernel, S=S)
    h_mean = pl.pallas_call(
        kernel,
        out_shape=jax.ShapeDtypeStruct((B, 1, H), jnp.float32),
        grid_spec=pltpu.PrefetchScalarGridSpec(
            num_scalar_prefetch=1,            # ids -> SMEM, visible to index_maps too
            grid=(B,),
            in_specs=[
                # Whole folded table resident in VMEM; block index constant across
                # the grid so it is DMA'd once (no per-step re-fetch).
                pl.BlockSpec((V, 1, H), lambda b, ids: (0, 0, 0)),
            ],
            out_specs=pl.BlockSpec((1, 1, H), lambda b, ids: (b, 0, 0)),
        ),
        compiler_params=pltpu.CompilerParams(
            dimension_semantics=("parallel",),   # lets v7x spread batch rows over 2 TCs
        ),
    )(ids_flat, table)

    # fc2 on the already-averaged activations: tiny (B,H)@(H,1) + b2, done by XLA
    # so the kernel avoids a lane-width-1 matmul and a masked (B,1) store.
    h_mean = h_mean.reshape(B, H)
    return jnp.dot(h_mean, w2) + b2[0]


def _reference_forward(ids, emb, w1, b1, w2, b2):
    x = jnp.take(emb, ids, axis=0)                 # (B, S, E)
    h = jnp.maximum(x @ w1 + b1[0], 0.0)           # (B, S, H)
    y = h @ w2 + b2[0]                             # (B, S, 1)
    return jnp.mean(y, axis=1)                     # (B, 1)


if __name__ == "__main__":
    # Small shapes implied by the module: vocab (input_size)=16, embedding_dim=32,
    # hidden_size=32, batch=2, seq=8.
    V, E, H = 16, 32, 32
    B, S = 2, 8

    key = jax.random.PRNGKey(0)
    k_ids, k_emb, k_w1, k_b1, k_w2, k_b2 = jax.random.split(key, 6)

    ids = jax.random.randint(k_ids, (B, S), 0, V, dtype=jnp.int32)

    # Deterministic parameter init (mimicking nn.Embedding N(0,1) and nn.Linear uniform).
    emb = jax.random.normal(k_emb, (V, E), dtype=jnp.float32)
    lim1 = 1.0 / jnp.sqrt(jnp.float32(E))
    w1 = jax.random.uniform(k_w1, (E, H), jnp.float32, -lim1, lim1)
    b1 = jax.random.uniform(k_b1, (1, H), jnp.float32, -lim1, lim1)
    lim2 = 1.0 / jnp.sqrt(jnp.float32(H))
    w2 = jax.random.uniform(k_w2, (H, 1), jnp.float32, -lim2, lim2)
    b2 = jax.random.uniform(k_b2, (1, 1), jnp.float32, -lim2, lim2)

    out = espionai_forward(ids, emb, w1, b1, w2, b2)
    out = jax.block_until_ready(out)

    ref = _reference_forward(ids, emb, w1, b1, w2, b2)
    assert out.shape == (B, 1), out.shape
    assert jnp.allclose(out, ref, atol=1e-5, rtol=1e-5), (out, ref)

    print("KERNEL_OK")
</pallas_src>

<mosaic_0001>
module attributes {stable_mosaic.version = 11 : i64} {
  func.func @_espionai_kernel(%arg0: i32, %arg1: memref<16xi32, #tpu.memory_space<smem>>, %arg2: memref<16x1x32xf32, #tpu.memory_space<vmem>>, %arg3: memref<1x1x32xf32, #tpu.memory_space<vmem>>) attributes {dimension_semantics = [#tpu.dimension_semantics<parallel>], iteration_bounds = array<i64: 2>, scalar_prefetch = 1 : i64, scratch_operands = 0 : i64, tpu.core_type = #tpu.core_type<tc>, window_params = [{pipeline_mode = #tpu.pipeline_mode<synchronous>, transform_indices = @transform_0, window_bounds = array<i64: 16, 1, 32>}, {transform_indices = @transform_1, window_bounds = array<i64: 1, 1, 32>}]} {
    %cst = arith.constant 0.000000e+00 : f32
    %0 = vector.broadcast %cst : f32 to vector<1x32xf32>
    %c0_i32 = arith.constant 0 : i32
    %c8_i32 = arith.constant 8 : i32
    %1 = arith.muli %arg0, %c8_i32 : i32
    %2 = arith.addi %1, %c0_i32 : i32
    %3 = arith.index_cast %2 : i32 to index
    %4 = memref.load %arg1[%3] : memref<16xi32, #tpu.memory_space<smem>>
    %5 = arith.index_cast %4 : i32 to index
    %c0 = arith.constant 0 : index
    %c0_0 = arith.constant 0 : index
    %6 = vector.load %arg2[%5, %c0, %c0_0] : memref<16x1x32xf32, #tpu.memory_space<vmem>>, vector<1x1x32xf32>
    %7 = vector.shape_cast %6 : vector<1x1x32xf32> to vector<1x32xf32>
    %cst_1 = arith.constant 0.000000e+00 : f32
    %8 = vector.broadcast %cst_1 : f32 to vector<1x32xf32>
    %9 = arith.maximumf %7, %8 : vector<1x32xf32>
    %10 = arith.addf %0, %9 : vector<1x32xf32>
    %c1_i32 = arith.constant 1 : i32
    %c8_i32_2 = arith.constant 8 : i32
    %11 = arith.muli %arg0, %c8_i32_2 : i32
    %12 = arith.addi %11, %c1_i32 : i32
    %13 = arith.index_cast %12 : i32 to index
    %14 = memref.load %arg1[%13] : memref<16xi32, #tpu.memory_space<smem>>
    %15 = arith.index_cast %14 : i32 to index
    %c0_3 = arith.constant 0 : index
    %c0_4 = arith.constant 0 : index
    %16 = vector.load %arg2[%15, %c0_3, %c0_4] : memref<16x1x32xf32, #tpu.memory_space<vmem>>, vector<1x1x32xf32>
    %17 = vector.shape_cast %16 : vector<1x1x32xf32> to vector<1x32xf32>
    %cst_5 = arith.constant 0.000000e+00 : f32
    %18 = vector.broadcast %cst_5 : f32 to vector<1x32xf32>
    %19 = arith.maximumf %17, %18 : vector<1x32xf32>
    %20 = arith.addf %10, %19 : vector<1x32xf32>
    %c2_i32 = arith.constant 2 : i32
    %c8_i32_6 = arith.constant 8 : i32
    %21 = arith.muli %arg0, %c8_i32_6 : i32
    %22 = arith.addi %21, %c2_i32 : i32
    %23 = arith.index_cast %22 : i32 to index
    %24 = memref.load %arg1[%23] : memref<16xi32, #tpu.memory_space<smem>>
    %25 = arith.index_cast %24 : i32 to index
    %c0_7 = arith.constant 0 : index
    %c0_8 = arith.constant 0 : index
    %26 = vector.load %arg2[%25, %c0_7, %c0_8] : memref<16x1x32xf32, #tpu.memory_space<vmem>>, vector<1x1x32xf32>
    %27 = vector.shape_cast %26 : vector<1x1x32xf32> to vector<1x32xf32>
    %cst_9 = arith.constant 0.000000e+00 : f32
    %28 = vector.broadcast %cst_9 : f32 to vector<1x32xf32>
    %29 = arith.maximumf %27, %28 : vector<1x32xf32>
    %30 = arith.addf %20, %29 : vector<1x32xf32>
    %c3_i32 = arith.constant 3 : i32
    %c8_i32_10 = arith.constant 8 : i32
    %31 = arith.muli %arg0, %c8_i32_10 : i32
    %32 = arith.addi %31, %c3_i32 : i32
    %33 = arith.index_cast %32 : i32 to index
    %34 = memref.load %arg1[%33] : memref<16xi32, #tpu.memory_space<smem>>
    %35 = arith.index_cast %34 : i32 to index
    %c0_11 = arith.constant 0 : index
    %c0_12 = arith.constant 0 : index
    %36 = vector.load %arg2[%35, %c0_11, %c0_12] : memref<16x1x32xf32, #tpu.memory_space<vmem>>, vector<1x1x32xf32>
    %37 = vector.shape_cast %36 : vector<1x1x32xf32> to vector<1x32xf32>
    %cst_13 = arith.constant 0.000000e+00 : f32
    %38 = vector.broadcast %cst_13 : f32 to vector<1x32xf32>
    %39 = arith.maximumf %37, %38 : vector<1x32xf32>
    %40 = arith.addf %30, %39 : vector<1x32xf32>
    %c4_i32 = arith.constant 4 : i32
    %c8_i32_14 = arith.constant 8 : i32
    %41 = arith.muli %arg0, %c8_i32_14 : i32
    %42 = arith.addi %41, %c4_i32 : i32
    %43 = arith.index_cast %42 : i32 to index
    %44 = memref.load %arg1[%43] : memref<16xi32, #tpu.memory_space<smem>>
    %45 = arith.index_cast %44 : i32 to index
    %c0_15 = arith.constant 0 : index
    %c0_16 = arith.constant 0 : index
    %46 = vector.load %arg2[%45, %c0_15, %c0_16] : memref<16x1x32xf32, #tpu.memory_space<vmem>>, vector<1x1x32xf32>
    %47 = vector.shape_cast %46 : vector<1x1x32xf32> to vector<1x32xf32>
    %cst_17 = arith.constant 0.000000e+00 : f32
    %48 = vector.broadcast %cst_17 : f32 to vector<1x32xf32>
    %49 = arith.maximumf %47, %48 : vector<1x32xf32>
    %50 = arith.addf %40, %49 : vector<1x32xf32>
    %c5_i32 = arith.constant 5 : i32
    %c8_i32_18 = arith.constant 8 : i32
    %51 = arith.muli %arg0, %c8_i32_18 : i32
    %52 = arith.addi %51, %c5_i32 : i32
    %53 = arith.index_cast %52 : i32 to index
    %54 = memref.load %arg1[%53] : memref<16xi32, #tpu.memory_space<smem>>
    %55 = arith.index_cast %54 : i32 to index
    %c0_19 = arith.constant 0 : index
    %c0_20 = arith.constant 0 : index
    %56 = vector.load %arg2[%55, %c0_19, %c0_20] : memref<16x1x32xf32, #tpu.memory_space<vmem>>, vector<1x1x32xf32>
    %57 = vector.shape_cast %56 : vector<1x1x32xf32> to vector<1x32xf32>
    %cst_21 = arith.constant 0.000000e+00 : f32
    %58 = vector.broadcast %cst_21 : f32 to vector<1x32xf32>
    %59 = arith.maximumf %57, %58 : vector<1x32xf32>
    %60 = arith.addf %50, %59 : vector<1x32xf32>
    %c6_i32 = arith.constant 6 : i32
    %c8_i32_22 = arith.constant 8 : i32
    %61 = arith.muli %arg0, %c8_i32_22 : i32
    %62 = arith.addi %61, %c6_i32 : i32
    %63 = arith.index_cast %62 : i32 to index
    %64 = memref.load %arg1[%63] : memref<16xi32, #tpu.memory_space<smem>>
    %65 = arith.index_cast %64 : i32 to index
    %c0_23 = arith.constant 0 : index
    %c0_24 = arith.constant 0 : index
    %66 = vector.load %arg2[%65, %c0_23, %c0_24] : memref<16x1x32xf32, #tpu.memory_space<vmem>>, vector<1x1x32xf32>
    %67 = vector.shape_cast %66 : vector<1x1x32xf32> to vector<1x32xf32>
    %cst_25 = arith.constant 0.000000e+00 : f32
    %68 = vector.broadcast %cst_25 : f32 to vector<1x32xf32>
    %69 = arith.maximumf %67, %68 : vector<1x32xf32>
    %70 = arith.addf %60, %69 : vector<1x32xf32>
    %c7_i32 = arith.constant 7 : i32
    %c8_i32_26 = arith.constant 8 : i32
    %71 = arith.muli %arg0, %c8_i32_26 : i32
    %72 = arith.addi %71, %c7_i32 : i32
    %73 = arith.index_cast %72 : i32 to index
    %74 = memref.load %arg1[%73] : memref<16xi32, #tpu.memory_space<smem>>
    %75 = arith.index_cast %74 : i32 to index
    %c0_27 = arith.constant 0 : index
    %c0_28 = arith.constant 0 : index
    %76 = vector.load %arg2[%75, %c0_27, %c0_28] : memref<16x1x32xf32, #tpu.memory_space<vmem>>, vector<1x1x32xf32>
    %77 = vector.shape_cast %76 : vector<1x1x32xf32> to vector<1x32xf32>
    %cst_29 = arith.constant 0.000000e+00 : f32
    %78 = vector.broadcast %cst_29 : f32 to vector<1x32xf32>
    %79 = arith.maximumf %77, %78 : vector<1x32xf32>
    %80 = arith.addf %70, %79 : vector<1x32xf32>
    %c8_i32_30 = arith.constant 8 : i32
    %cst_31 = arith.constant 1.250000e-01 : f32
    %81 = vector.broadcast %cst_31 : f32 to vector<1x32xf32>
    %82 = arith.mulf %80, %81 : vector<1x32xf32>
    %c0_32 = arith.constant 0 : index
    %c0_33 = arith.constant 0 : index
    %c0_34 = arith.constant 0 : index
    %83 = vector.load %arg3[%c0_32, %c0_33, %c0_34] : memref<1x1x32xf32, #tpu.memory_space<vmem>>, vector<1x1x32xf32>
    %84 = vector.shape_cast %83 : vector<1x1x32xf32> to vector<1x32xf32>
    %85 = vector.shape_cast %82 : vector<1x32xf32> to vector<1x1x32xf32>
    tpu.vector_store %arg3[%c0_32, %c0_33, %c0_34], %85 {strides = array<i32>} : memref<1x1x32xf32, #tpu.memory_space<vmem>>, vector<1x1x32xf32>,
    return
  }
  func.func @transform_0(%arg0: i32, %arg1: memref<16xi32, #tpu.memory_space<smem>>) -> (i32, i32, i32) {
    %c0_i32 = arith.constant 0 : i32
    %c0_i32_0 = arith.constant 0 : i32
    %c0_i32_1 = arith.constant 0 : i32
    %c0_i32_2 = arith.constant 0 : i32
    return %c0_i32, %c0_i32_0, %c0_i32_1 : i32, i32, i32
  }
  func.func @transform_1(%arg0: i32, %arg1: memref<16xi32, #tpu.memory_space<smem>>) -> (i32, i32, i32) {
    %c0_i32 = arith.constant 0 : i32
    %c0_i32_0 = arith.constant 0 : i32
    %c0_i32_1 = arith.constant 0 : i32
    return %arg0, %c0_i32, %c0_i32_0 : i32, i32, i32
  }
}

</mosaic_0001>

<bundles_post_ra>
// kernel: tpu_custom_call.1
= control target key start
LH: loop header
LB: loop body
LE: loop exit
PB: predicated region body
PF: predicated region fallthrough
CT: control target
= control target key end

     0   :  { %s405_s9 = smov [#allocation3]   ;;  %s529_s0 = inlined_call_operand.hbm [shape: s32[16], index: 0, kind: input, shape index: {}]   ;;  %s530_s1 = inlined_call_operand.hbm [shape: f32[16,1,32], index: 1, kind: input, shape index: {}]   ;;  %s531_s2 = inlined_call_operand.hbm [shape: f32[2,1,32], index: 2, kind: output, shape index: {}]  }
   0x1   :  { %8 = dma.hbm_to_smem %s529_s0, 16, %s405_s9, [#allocation2] }
   0x2   :  { %379 = dma.done.wait [#allocation2], 16 }
   0x3   :  { %380 = vsyncadd [#allocation2], 4294967280 }
   0x4   :  { %10 = sfence }
   0x5   :  { %11 = vsyncpa [#allocation5], 0 }
   0x6   :  { %12 = vsyncpa [#allocation6], 0 }
   0x7   :  { %14 = vsyncpa [#allocation6 + $0x1], 0  ;;  %s428_s12 = smov 0   ;;  %s430_s13 = smov 0  }
   0x8   :  { %s432_s14 = smov 0   ;;  %s434_s15 = smov 0  }
   0x9 LB: > { %s449_s0 = sadd.s32 4294967295, %s403_s15   ;;  %s241_s16 = sadd.s32 4294967294, %s403_s15   ;;  %s403_s15 = sphi %s434_s15, %s539_s15   ;;  %s399_s14 = sphi %s432_s14, %s538_s14   ;;  %s395_s13 = sphi %s430_s13, %s537_s13   ;;  %s391_s12 = sphi %s428_s12, %s536_s12  }
   0xa   : > { %s453_s17 = sadd.s32 1, %s403_s15   ;;  %s48_s18 = sadd.s32 1, %s399_s14 }
   0xb   : > { %s45_s19 = ssub.s32 %s403_s15, %s453_s17  ;;  %p58_p0 = scmp.ne.s32.totalorder %s399_s14, %s395_s13 }
   0xc   : > { %p46_p1 = scmp.eq.s32.totalorder %s45_s19, 0  ;;  %p59_p2 = scmp.eq.s32.totalorder %s449_s0, 1 }
   0xd   : > { %p64_p3 = scmp.ne.s32.totalorder %s395_s13, %s391_s12  ;;  %p65_p4 = scmp.eq.s32.totalorder %s241_s16, 1 }
   0xe   : > { %s464_s20 = scalar_select %p46_p1, %s399_s14, %s48_s18  }
   0xf   : > { %p466_p5 = por %p59_p2, %p58_p0  ;;  %p470_p6 = por %p65_p4, %p64_p3 }
  0x10   : > { %p242_p7 = scmp.ge.s32.totalorder %s403_s15, 1  ;;  %p72_p8 = scmp.lt.s32.totalorder %s403_s15, 3 }
  0x11   : > { %s533_s22 = scalar_select %p470_p6, 1, 0 }
  0x12   : > { %p264_p9 = scmp.eq.s32.totalorder %s449_s0, 0  ;;  %p477_p10 = pnand %p242_p7, %p72_p8 }
  0x13   : > { %s406_s24 = smov [#allocation4]  }
  0x14   : > { %s84_s25 = sshll.u32 %s406_s24, 4  ;;  %p256_p11 = pneg %p477_p10  ;;  %s85_s25 = int_to_ptr.vmem [resolvable:$true] %s84_s25 }
  0x15   : > { %s322_s26 = scalar_lea.vmem %s85_s25, 256  ;;  %p330_p3 = scmp.lt.s32.totalorder %s85_s25, %s85_s25 }
  0x16   : > { %p257_p12 = pnand %p264_p9, %p256_p11  ;;  %p323_p0 = scmp.ne.s32.totalorder %s85_s25, %s322_s26 }
  0x17   : > { %p331_p4 = scmp.lt.s32.totalorder %s322_s26, %s322_s26 }
  0x18   : > { %p313_p13 = pneg %p257_p12 }
  0x19   : > { %p332_p6 = por %p331_p4, %p330_p3 }
  0x1a   : > { %p325_p1 = pnand %p323_p0, %p313_p13 }
  0x1c   : > { %p326_p2 = pneg %p325_p1 }
  0x1e   : > { %p333_p7 = pnand %p332_p6, %p326_p2 }
  0x20   : > { %336 = shalt.err (!%p333_p7)
}
  0x21   : > { %s407_s27 = smov 16   ;;  %s408_s28 = smov 1  }
  0x22   : > { %259 = dma.hbm_to_vmem [thread:$0]  (!%p257_p12), %s530_s1, 256, %s85_s25, [#allocation5], %s407_s27, %s407_s27, %s408_s28  }
  0x23   : > { %100 = sbr.rel (%p477_p10) target bundleno = 82 (0x52), region = 24 }
  0x28   : > { %382 = dma.done.wait (%p264_p9), [#allocation5], 256  }
  0x29   : > { %384 = vsyncadd (%p264_p9), [#allocation5], 4294967040  ;;  %s246_s3 = sshll.u32 %s449_s0, 3  ;;  %vm163_vm0 = vcmask 253952  }
  0x2a   : > { %s115_s4 = sld [smem:[#allocation3 + %s246_s3]]  ;;  %s120_s5 = sadd.s32 1, %s246_s3 }
  0x2b   : > { %s126_s6 = sadd.s32 2, %s246_s3  ;;  %s121_s7 = sld [smem:[#allocation3 + %s120_s5]] }
  0x2c   : > { %s132_s8 = sadd.s32 3, %s246_s3  ;;  %s127_s9 = sld [smem:[#allocation3 + %s126_s6]] }
  0x2d   : > { %s138_s10 = sadd.s32 4, %s246_s3  ;;  %s133_s11 = sld [smem:[#allocation3 + %s132_s8]] }
  0x2e   : > { %s144_s16 = sadd.s32 5, %s246_s3  ;;  %s139_s18 = sld [smem:[#allocation3 + %s138_s10]] }
  0x2f   : > { %s150_s19 = sadd.s32 6, %s246_s3  ;;  %s145_s23 = sld [smem:[#allocation3 + %s144_s16]] }
  0x30   : > { %s116_s24 = scalar_lea.vmem [#allocation4], %s115_s4  ;;  %s151_s25 = sld [smem:[#allocation3 + %s150_s19]] }
  0x31   : > { %v117_v0 = vld [vmem:[%s116_s24] sm:$0x1]  ;;  %s156_s26 = sadd.s32 7, %s246_s3  ;;  %s122_s28 = scalar_lea.vmem [#allocation4], %s121_s7 }
  0x32   : > { %v118_v1 = vmax.f32 %v117_v0, 0.0  ;;  %s157_s27 = sld [smem:[#allocation3 + %s156_s26]]  ;;  %v123_v2 = vld [vmem:[%s122_s28] sm:$0x1]  ;;  %s128_s29 = scalar_lea.vmem [#allocation4], %s127_s9 }
  0x33   : > { %v124_v3 = vmax.f32 %v123_v2, 0.0  ;;  %v129_v4 = vld [vmem:[%s128_s29] sm:$0x1]  ;;  %s134_s30 = scalar_lea.vmem [#allocation4], %s133_s11  ;;  %s112_s4 = sand.u32 1, %s395_s13  }
  0x34   : > { %v130_v5 = vmax.f32 %v129_v4, 0.0  ;;  %v135_v6 = vld [vmem:[%s134_s30] sm:$0x1]  ;;  %s140_s5 = scalar_lea.vmem [#allocation4], %s139_s18  ;;  %s113_s8 = scalar_lea.vmem [#allocation7], %s112_s4 }
  0x35   : > { %v125_v7 = vadd.f32 %v124_v3, %v118_v1  ;;  %v136_v8 = vmax.f32 %v135_v6, 0.0  ;;  %v141_v9 = vld [vmem:[%s140_s5] sm:$0x1]  ;;  %s146_s6 = scalar_lea.vmem [#allocation4], %s145_s23  ;;  %s178_s9 = sshll.u32 %s113_s8, 4  ;;  %s179_s9 = int_to_ptr.vmem [resolvable:$true] %s178_s9 }
  0x36   : > { %v147_v10 = vld [vmem:[%s146_s6] sm:$0x1]  ;;  %v142_v12 = vmax.f32 %v141_v9, 0.0  ;;  %s152_s3 = scalar_lea.vmem [#allocation4], %s151_s25  ;;  %s247_s10 = sshll.u32 %s449_s0, 4 }
  0x37   : > { %v131_v11 = vadd.f32 %v130_v5, %v125_v7  ;;  %v153_v13 = vld [vmem:[%s152_s3] sm:$0x1]  ;;  %v148_v15 = vmax.f32 %v147_v10, 0.0  ;;  %s176_s18 = scalar_lea.hbm %s531_s2, %s247_s10  ;;  %s166_s19 = scalar_lea.sflag [#allocation6], %s112_s4 }
  0x38   : > { %s158_s7 = scalar_lea.vmem [#allocation4], %s157_s27  ;;  %v154_v18 = vmax.f32 %v153_v13, 0.0  ;;  %s337_s23 = scalar_lea.vmem %s179_s9, 16 }
  0x39   : > { %v137_v14 = vadd.f32 %v136_v8, %v131_v11  ;;  %v159_v16 = vld [vmem:[%s158_s7] sm:$0x1]  ;;  %p338_p6 = scmp.ne.s32.totalorder %s179_s9, %s337_s23  ;;  %s409_s24 = smov [#allocation7]  }
  0x3a   : > { %v160_v20 = vmax.f32 %v159_v16, 0.0  ;;  %s341_s25 = sshll.u32 %s409_s24, 4  ;;  %s342_s25 = int_to_ptr.vmem [resolvable:$false] %s341_s25 }
  0x3b   : > { %v143_v17 = vadd.f32 %v142_v12, %v137_v14  ;;  %p339_p8 = pnand %p338_p6, %p466_p5  ;;  %s343_s26 = scalar_lea.vmem %s342_s25, 32 }
  0x3c   : > { %p344_p10 = scmp.lt.s32.totalorder %s179_s9, %s342_s25  ;;  %p345_p11 = scmp.lt.s32.totalorder %s343_s26, %s337_s23 }
  0x3d   : > { %v149_v19 = vadd.f32 %v148_v15, %v143_v17  ;;  %p340_p9 = pneg %p339_p8 }
  0x3e   : > { %p346_p12 = por %p345_p11, %p344_p10 }
  0x3f   : > { %v155_v21 = vadd.f32 %v154_v18, %v149_v19 }
  0x40   : > { %p347_p13 = pnand %p346_p12, %p340_p9 }
  0x41   : > { %v161_v22 = vadd.f32 %v160_v20, %v155_v21 }
  0x43   : > { %v162_v23 = vmul.f32 0.125, %v161_v22 }
  0x45   : > { %164 = vst.msk [vmem:[%s113_s8] sm:$0x1] %vm163_vm0, %v162_v23 }
  0x46   : > { %350 = shalt.err (!%p347_p13)
}
  0x47   : > { %s351_s0 = scalar_lea.hbm %s176_s18, 16  ;;  %s355_s29 = scalar_lea.hbm %s531_s2, 32 }
  0x48   : > { %p352_p0 = scmp.ne.s32.totalorder %s176_s18, %s351_s0  ;;  %p356_p3 = scmp.lt.s32.totalorder %s176_s18, %s531_s2 }
  0x49   : > { %p357_p4 = scmp.lt.s32.totalorder %s355_s29, %s351_s0 }
  0x4a   : > { %p353_p1 = pnand %p352_p0, %p466_p5 }
  0x4b   : > { %p358_p7 = por %p357_p4, %p356_p3 }
  0x4c   : > { %p354_p2 = pneg %p353_p1 }
  0x4e   : > { %p359_p6 = pnand %p358_p7, %p354_p2 }
  0x50   : > { %362 = shalt.err (!%p359_p6)
}
  0x51   : > { %254 = dma.vmem_to_hbm [thread:$0]  (%p466_p5), %s179_s9, 16, %s176_s18, %s166_s19  }
  0x52 PF: > { %p266_p8 = scmp.ge.s32.totalorder %s403_s15, 2  ;;  %s190_s6 = sand.u32 1, %s391_s12  }
  0x53   : > { %p535_p9 = scmp.ne.s32.totalorder %s533_s22, 0  ;;  %s191_s3 = scalar_lea.sflag [#allocation6], %s190_s6 }
  0x55   : > { %p261_p10 = pnand %p266_p8, %p535_p9 }
  0x57   : > { %p262_p11 = pneg %p261_p10 }
  0x59   : > { %386 = dma.done.wait (%p262_p11), %s191_s3, 16  }
  0x5a   : > { %388 = vsyncadd (%p262_p11), %s191_s3, 4294967280  ;;  %p17_p12 = scmp.ge.s32.totalorder %s453_s17, 4   ;;  %s536_s12 = smov %s395_s13 }
  0x5b   : > { %s537_s13 = smov %s399_s14  ;;  %s538_s14 = smov %s464_s20 }
  0x5c   : > { %s539_s15 = smov %s453_s17  ;;  %19 = sbr.rel (!%p17_p12) target bundleno = 9 (0x9), region = 69 }
  0x61   :  { %195 = vsyncpa [#allocation5], 1 }
  0x62   :  { %197 = vsyncpa [#allocation5 + $0x1], 1 }
  0x63   :  { %198 = vsyncpa [#allocation6], 1 }
  0x64   :  { %200 = vsyncpa [#allocation6 + $0x1], 1 }

</bundles_post_ra>
